<compile_context>
chip_gen: v7x
topology: tpu7x:2x2x1
jax: 0.10.0
libtpu: 0.0.40
codegen_flags: <defaults>
</compile_context>

<pallas_src>
import functools
import math

import jax
import jax.numpy as jnp
from jax.experimental import pallas as pl
from jax.experimental.pallas import tpu as pltpu


def _flash_attention_kernel(q_ref, k_ref, v_ref, o_ref,
                            m_ref, l_ref, acc_ref, qs_ref,
                            *, scale, exp_dtype, kv_len):
    """One (bh, q_tile, kv_tile) grid step of flash attention.

    q_ref: (1, tq, D) VMEM tile        k_ref / v_ref: (1, tk, D) VMEM tiles
    o_ref: (1, tq, D) output tile (written only on the last kv step)
    m_ref / l_ref: (tq, 1) f32 running max / denominator
    acc_ref: (tq, D) f32 running numerator
    qs_ref:  (tq, D) mxu-dtype scaled Q, written once per q tile
    kv_len:  None, or the unpadded sequence length (enables kv masking)
    """
    kv_step = pl.program_id(2)

    # --- init accumulators / hoisted Q at the start of each reduction ---
    @pl.when(kv_step == 0)
    def _():
        m_ref[...] = jnp.full(m_ref.shape, -jnp.inf, dtype=m_ref.dtype)
        l_ref[...] = jnp.zeros(l_ref.shape, dtype=l_ref.dtype)
        acc_ref[...] = jnp.zeros(acc_ref.shape, dtype=acc_ref.dtype)
        # 1/sqrt(d_k) folded into Q once per q tile (O(S*D) VPU work instead
        # of O(S^2)); the scaled/cast Q is reused across every kv step.
        qs_ref[...] = (q_ref[0] * scale).astype(qs_ref.dtype)

    q = qs_ref[...]                               # (tq, D) mxu dtype
    k = k_ref[0]                                  # (tk, D) mxu dtype (wrapper cast)
    v = v_ref[0]                                  # (tk, D) mxu dtype

    # scores = q @ k^T as a transposed-RHS contraction -> no XLU transpose.
    s = jax.lax.dot_general(
        q, k, dimension_numbers=(((1,), (1,)), ((), ())),
        preferred_element_type=jnp.float32)       # (tq, tk) f32

    if kv_len is not None:
        # Mask kv positions that are sequence padding (ragged-S path).
        tk_dim = s.shape[-1]
        kv_idx = kv_step * tk_dim + jax.lax.broadcasted_iota(
            jnp.int32, s.shape, 1)
        s = jnp.where(kv_idx < kv_len, s, -1e30)

    # --- online softmax update (stats kept in f32 for all chip gens) ---
    m_prev = m_ref[...]
    m_new = jnp.maximum(m_prev, jnp.max(s, axis=-1, keepdims=True))
    alpha = jnp.exp(m_prev - m_new)               # (tq, 1) rescale factor
    # exp in bf16 on v6e/v7x (bf16 EUP/VPU); f32 on v5e / unknown chips.
    p = jnp.exp((s - m_new).astype(exp_dtype))    # (tq, tk)

    l_ref[...] = alpha * l_ref[...] + jnp.sum(
        p, axis=-1, keepdims=True, dtype=jnp.float32)
    acc_ref[...] = alpha * acc_ref[...] + jnp.dot(
        p.astype(v.dtype), v, preferred_element_type=jnp.float32)
    m_ref[...] = m_new

    # --- finalize: normalize and write the output tile exactly once ---
    @pl.when(kv_step == pl.num_programs(2) - 1)
    def _():
        inv_l = pl.reciprocal(l_ref[...], approx=True)   # EUP vrcp, ~free
        o_ref[0] = (acc_ref[...] * inv_l).astype(o_ref.dtype)


def _round_up(x, m):
    return ((x + m - 1) // m) * m


def _device_kind():
    try:
        return jax.devices()[0].device_kind.lower()
    except Exception:  # pragma: no cover - defensive
        return ""


def _estimate_vmem_bytes(tq, tk, D, in_itemsize, out_itemsize):
    """Rough VMEM footprint for one pipeline stage (double-buffered blocks)."""
    blocks = 2 * (tq * D * in_itemsize          # Q double buffer
                  + 2 * tk * D * in_itemsize    # K + V double buffers
                  + tq * D * out_itemsize)      # O double buffer
    scratch = tq * D * 4 + tq * D * in_itemsize + 2 * tq * 4
    live = 3 * tq * tk * 4                      # s/p intermediates + headroom
    return blocks + scratch + live


def _select_tiles(Sp, D, in_itemsize, out_itemsize, vmem_budget):
    """Largest Q tile (re-stream reduction) first; KV tile stays modest."""
    tq_cands = [t for t in (1024, 512, 256, 128) if t <= Sp and Sp % t == 0]
    tk_cands = [t for t in (512, 256, 128) if t <= Sp and Sp % t == 0]
    if not tq_cands:
        tq_cands = [Sp]
    if not tk_cands:
        tk_cands = [Sp]
    for tq in tq_cands:
        for tk in tk_cands:
            if _estimate_vmem_bytes(tq, tk, D, in_itemsize, out_itemsize) \
                    <= vmem_budget:
                return tq, tk
    return tq_cands[-1], tk_cands[-1]


def attention_head(Q, K, V, *, tq=None, tk=None, use_bf16_mxu=True):
    """softmax(Q @ K^T / sqrt(d_head)) @ V for (B, H, S, D) inputs.

    Note: with use_bf16_mxu=True the MXU operands (and exp on v6e/v7x) run in
    bf16 while all softmax stats / accumulators stay f32; pass
    use_bf16_mxu=False for an all-f32 path.
    """
    B, H, S, D = Q.shape
    assert K.shape == (B, H, S, D) and V.shape == (B, H, S, D)
    BH = B * H
    scale = 1.0 / math.sqrt(D)        # torch uses Q.shape[-1] = d_head
    out_dtype = Q.dtype

    kind = _device_kind()
    is_v7x = "v7" in kind
    bf16_eup = ("v6" in kind) or is_v7x

    q = Q.reshape(BH, S, D)
    k = K.reshape(BH, S, D)
    v = V.reshape(BH, S, D)

    # Cast once in HBM: the K/V re-stream dominates HBM traffic, so one
    # wrapper-side cast pass is amortized over the S/tq re-reads.
    mxu_dtype = jnp.bfloat16 if (use_bf16_mxu and q.dtype == jnp.float32) \
        else q.dtype
    if mxu_dtype != q.dtype:
        q = q.astype(mxu_dtype)
        k = k.astype(mxu_dtype)
        v = v.astype(mxu_dtype)
    exp_dtype = jnp.bfloat16 if (bf16_eup and mxu_dtype == jnp.bfloat16) \
        else jnp.float32

    # Ragged long sequences: pad to a multiple of 128 and mask in-kernel so
    # we never fall back to a full (S, S) live score block.  Short ragged S
    # uses a single full-extent tile (legal block shape, small footprint).
    Sp = S
    if S % 128 != 0 and S > 1024:
        Sp = _round_up(S, 128)
        pad = ((0, 0), (0, Sp - S), (0, 0))
        q = jnp.pad(q, pad)
        k = jnp.pad(k, pad)
        v = jnp.pad(v, pad)
    kv_len = S if Sp != S else None

    # Generation-aware VMEM budget: v7x has only 64 MiB physical VMEM; v5e
    # and v6e have 128 MiB so big Q tiles (the single biggest lever on the
    # HBM-bound re-stream) are allowed to use much more than the default.
    if is_v7x:
        vmem_limit = 48 * 1024 * 1024
    elif ("v5" in kind) or ("v6" in kind):
        vmem_limit = 96 * 1024 * 1024
    else:
        vmem_limit = 32 * 1024 * 1024

    in_itemsize = jnp.dtype(mxu_dtype).itemsize
    out_itemsize = jnp.dtype(out_dtype).itemsize
    if tq is None or tk is None:
        tq_sel, tk_sel = _select_tiles(
            Sp, D, in_itemsize, out_itemsize, int(0.6 * vmem_limit))
        tq = tq if tq is not None else tq_sel
        tk = tk if tk is not None else tk_sel
    assert Sp % tq == 0 and Sp % tk == 0

    # v7x megacore: keep the 'parallel' extent (BH * Sp/tq) >= 2 so both
    # TensorCores get work.
    if is_v7x:
        while (BH * (Sp // tq) < 2 and tq > 128 and tq % 2 == 0
               and Sp % (tq // 2) == 0):
            tq //= 2

    kernel = functools.partial(
        _flash_attention_kernel, scale=scale, exp_dtype=exp_dtype,
        kv_len=kv_len)

    q_spec = pl.BlockSpec((1, tq, D), lambda b, i, j: (b, i, 0))
    o_spec = pl.BlockSpec((1, tq, D), lambda b, i, j: (b, i, 0))
    kv_map = lambda b, i, j: (b, j, 0)
    kv_spec = pl.BlockSpec((1, tk, D), kv_map)
    if is_v7x and (Sp // tk) >= 3:
        # Per-TC HBM bandwidth grew less than MXU rate on v7x; a third KV
        # buffer costs only 2*tk*D*in_itemsize of VMEM.
        try:
            kv_spec = pl.BlockSpec((1, tk, D), kv_map,
                                   pipeline_mode=pl.Buffered(3))
        except TypeError:  # pragma: no cover - older API fallback
            kv_spec = pl.BlockSpec((1, tk, D), kv_map)

    # Cost estimate including the K/V re-read factor (x Sp/tq).
    n_q_tiles = Sp // tq
    cost = pl.CostEstimate(
        flops=4 * BH * Sp * Sp * D,                 # QK^T + PV, 2*S*S*D each
        transcendentals=BH * Sp * Sp,               # exp
        bytes_accessed=BH * Sp * D * (in_itemsize + out_itemsize
                                      + 2 * in_itemsize * n_q_tiles))

    out = pl.pallas_call(
        kernel,
        out_shape=jax.ShapeDtypeStruct((BH, Sp, D), out_dtype),
        grid=(BH, Sp // tq, Sp // tk),
        in_specs=[q_spec, kv_spec, kv_spec],
        out_specs=o_spec,
        scratch_shapes=[
            pltpu.VMEM((tq, 1), jnp.float32),    # running max m
            pltpu.VMEM((tq, 1), jnp.float32),    # running denominator l
            pltpu.VMEM((tq, D), jnp.float32),    # running numerator acc
            pltpu.VMEM((tq, D), mxu_dtype),      # hoisted scaled/cast Q
        ],
        compiler_params=pltpu.CompilerParams(
            # (B*H) and Q-tile axes shard across TensorCores (v7x megacore);
            # the KV axis carries the online-softmax reduction.
            dimension_semantics=("parallel", "parallel", "arbitrary"),
            vmem_limit_bytes=vmem_limit,
        ),
        cost_estimate=cost,
    )(q, k, v)

    if Sp != S:
        out = out[:, :S, :]
    return out.reshape(B, H, S, D)


if __name__ == "__main__":
    # Small deterministic example: batch=2, nheads=4, seq=8, d_head=16
    B, H, S, D = 2, 4, 8, 16
    key = jax.random.PRNGKey(0)
    kq, kk, kv = jax.random.split(key, 3)
    Q = jax.random.normal(kq, (B, H, S, D), dtype=jnp.float32)
    K = jax.random.normal(kk, (B, H, S, D), dtype=jnp.float32)
    V = jax.random.normal(kv, (B, H, S, D), dtype=jnp.float32)

    out = attention_head(Q, K, V)
    out = jax.block_until_ready(out)

    # Pure-JAX f32 reference for a correctness sanity check.
    scores = jnp.einsum("bhqd,bhkd->bhqk", Q, K) / math.sqrt(D)
    ref = jnp.einsum("bhqk,bhkd->bhqd", jax.nn.softmax(scores, axis=-1), V)
    assert out.shape == (B, H, S, D)
    # bf16 MXU operands (+ bf16 exp on v6e/v7x) + approx reciprocal => looser
    # tolerance than an all-f32 path (softmax stats/accumulators remain f32).
    assert jnp.allclose(out, ref, atol=5e-2, rtol=5e-2)

    print("KERNEL_OK")
</pallas_src>

<mosaic_0001>
module attributes {stable_mosaic.version = 11 : i64} {
  func.func @_flash_attention_kernel(%arg0: i32, %arg1: i32, %arg2: i32, %arg3: memref<1x8x16xbf16, #tpu.memory_space<vmem>>, %arg4: memref<1x8x16xbf16, #tpu.memory_space<vmem>>, %arg5: memref<1x8x16xbf16, #tpu.memory_space<vmem>>, %arg6: memref<1x8x16xf32, #tpu.memory_space<vmem>>, %arg7: memref<8x1xf32, #tpu.memory_space<vmem>>, %arg8: memref<8x1xf32, #tpu.memory_space<vmem>>, %arg9: memref<8x16xf32, #tpu.memory_space<vmem>>, %arg10: memref<8x16xbf16, #tpu.memory_space<vmem>>) attributes {dimension_semantics = [#tpu.dimension_semantics<parallel>, #tpu.dimension_semantics<parallel>, #tpu.dimension_semantics<arbitrary>], iteration_bounds = array<i64: 8, 1, 1>, scalar_prefetch = 0 : i64, scratch_operands = 4 : i64, tpu.core_type = #tpu.core_type<tc>, window_params = [{transform_indices = @transform_0, window_bounds = array<i64: 1, 8, 16>}, {transform_indices = @transform_1, window_bounds = array<i64: 1, 8, 16>}, {transform_indices = @transform_2, window_bounds = array<i64: 1, 8, 16>}, {transform_indices = @transform_3, window_bounds = array<i64: 1, 8, 16>}]} {
    %c0_i32 = arith.constant 0 : i32
    %0 = arith.cmpi eq, %arg2, %c0_i32 : i32
    %1 = arith.extui %0 : i1 to i32
    %c0_i32_0 = arith.constant 0 : i32
    %2 = arith.cmpi ne, %1, %c0_i32_0 : i32
    scf.if %2 {
      %cst_25 = arith.constant 0xFF800000 : f32
      %35 = vector.broadcast %cst_25 : f32 to vector<8x1xf32>
      %c0_26 = arith.constant 0 : index
      %c0_27 = arith.constant 0 : index
      %36 = vector.load %arg7[%c0_26, %c0_27] : memref<8x1xf32, #tpu.memory_space<vmem>>, vector<8x1xf32>
      tpu.vector_store %arg7[%c0_26, %c0_27], %35 {strides = array<i32>} : memref<8x1xf32, #tpu.memory_space<vmem>>, vector<8x1xf32>,
      %cst_28 = arith.constant 0.000000e+00 : f32
      %37 = vector.broadcast %cst_28 : f32 to vector<8x1xf32>
      %c0_29 = arith.constant 0 : index
      %c0_30 = arith.constant 0 : index
      %38 = vector.load %arg8[%c0_29, %c0_30] : memref<8x1xf32, #tpu.memory_space<vmem>>, vector<8x1xf32>
      tpu.vector_store %arg8[%c0_29, %c0_30], %37 {strides = array<i32>} : memref<8x1xf32, #tpu.memory_space<vmem>>, vector<8x1xf32>,
      %cst_31 = arith.constant 0.000000e+00 : f32
      %39 = vector.broadcast %cst_31 : f32 to vector<8x16xf32>
      %c0_32 = arith.constant 0 : index
      %c0_33 = arith.constant 0 : index
      %40 = vector.load %arg9[%c0_32, %c0_33] : memref<8x16xf32, #tpu.memory_space<vmem>>, vector<8x16xf32>
      tpu.vector_store %arg9[%c0_32, %c0_33], %39 {strides = array<i32>} : memref<8x16xf32, #tpu.memory_space<vmem>>, vector<8x16xf32>,
      %c0_34 = arith.constant 0 : index
      %c0_35 = arith.constant 0 : index
      %c0_36 = arith.constant 0 : index
      %41 = vector.load %arg3[%c0_34, %c0_35, %c0_36] : memref<1x8x16xbf16, #tpu.memory_space<vmem>>, vector<1x8x16xbf16>
      %42 = vector.shape_cast %41 : vector<1x8x16xbf16> to vector<8x16xbf16>
      %cst_37 = arith.constant 2.500000e-01 : bf16
      %43 = vector.broadcast %cst_37 : bf16 to vector<8x16xbf16>
      %44 = arith.mulf %42, %43 : vector<8x16xbf16>
      %c0_38 = arith.constant 0 : index
      %c0_39 = arith.constant 0 : index
      %45 = vector.load %arg10[%c0_38, %c0_39] : memref<8x16xbf16, #tpu.memory_space<vmem>>, vector<8x16xbf16>
      tpu.vector_store %arg10[%c0_38, %c0_39], %44 {strides = array<i32>} : memref<8x16xbf16, #tpu.memory_space<vmem>>, vector<8x16xbf16>,
    } else {
    }
    %c0 = arith.constant 0 : index
    %c0_1 = arith.constant 0 : index
    %3 = vector.load %arg10[%c0, %c0_1] : memref<8x16xbf16, #tpu.memory_space<vmem>>, vector<8x16xbf16>
    %c0_2 = arith.constant 0 : index
    %c0_3 = arith.constant 0 : index
    %c0_4 = arith.constant 0 : index
    %4 = vector.load %arg4[%c0_2, %c0_3, %c0_4] : memref<1x8x16xbf16, #tpu.memory_space<vmem>>, vector<1x8x16xbf16>
    %5 = vector.shape_cast %4 : vector<1x8x16xbf16> to vector<8x16xbf16>
    %c0_5 = arith.constant 0 : index
    %c0_6 = arith.constant 0 : index
    %c0_7 = arith.constant 0 : index
    %6 = vector.load %arg5[%c0_5, %c0_6, %c0_7] : memref<1x8x16xbf16, #tpu.memory_space<vmem>>, vector<1x8x16xbf16>
    %7 = vector.shape_cast %6 : vector<1x8x16xbf16> to vector<8x16xbf16>
    %cst = arith.constant dense<0.000000e+00> : vector<8x8xf32>
    %8 = tpu.matmul %3, %5, %cst {dimension_numbers = #tpu.dot_dimension_numbers<[1], [1], [0], [0], [0, 0, 1, 0], [], []>} : vector<8x16xbf16>, vector<8x16xbf16>, vector<8x8xf32> -> vector<8x8xf32>
    %c0_8 = arith.constant 0 : index
    %c0_9 = arith.constant 0 : index
    %9 = vector.load %arg7[%c0_8, %c0_9] : memref<8x1xf32, #tpu.memory_space<vmem>>, vector<8x1xf32>
    %cst_10 = arith.constant dense<0xFF800000> : vector<8xf32>
    %10 = vector.multi_reduction <maximumf>, %8, %cst_10 [1] : vector<8x8xf32> to vector<8xf32>
    %11 = vector.shape_cast %10 : vector<8xf32> to vector<8x1xf32>
    %12 = arith.maximumf %9, %11 : vector<8x1xf32>
    %13 = arith.subf %9, %12 : vector<8x1xf32>
    %14 = math.exp %13 : vector<8x1xf32>
    %15 = vector.broadcast %12 : vector<8x1xf32> to vector<8x8xf32>
    %16 = arith.subf %8, %15 : vector<8x8xf32>
    %17 = math.exp %16 : vector<8x8xf32>
    %c0_11 = arith.constant 0 : index
    %c0_12 = arith.constant 0 : index
    %18 = vector.load %arg8[%c0_11, %c0_12] : memref<8x1xf32, #tpu.memory_space<vmem>>, vector<8x1xf32>
    %19 = arith.mulf %14, %18 : vector<8x1xf32>
    %cst_13 = arith.constant dense<0.000000e+00> : vector<8xf32>
    %20 = vector.multi_reduction <add>, %17, %cst_13 [1] : vector<8x8xf32> to vector<8xf32>
    %21 = vector.shape_cast %20 : vector<8xf32> to vector<8x1xf32>
    %22 = arith.addf %19, %21 : vector<8x1xf32>
    %c0_14 = arith.constant 0 : index
    %c0_15 = arith.constant 0 : index
    %23 = vector.load %arg8[%c0_14, %c0_15] : memref<8x1xf32, #tpu.memory_space<vmem>>, vector<8x1xf32>
    tpu.vector_store %arg8[%c0_14, %c0_15], %22 {strides = array<i32>} : memref<8x1xf32, #tpu.memory_space<vmem>>, vector<8x1xf32>,
    %c0_16 = arith.constant 0 : index
    %c0_17 = arith.constant 0 : index
    %24 = vector.load %arg9[%c0_16, %c0_17] : memref<8x16xf32, #tpu.memory_space<vmem>>, vector<8x16xf32>
    %25 = vector.broadcast %14 : vector<8x1xf32> to vector<8x16xf32>
    %26 = arith.mulf %25, %24 : vector<8x16xf32>
    %27 = arith.truncf %17 : vector<8x8xf32> to vector<8x8xbf16>
    %cst_18 = arith.constant dense<0.000000e+00> : vector<8x16xf32>
    %28 = tpu.matmul %27, %7, %cst_18 {dimension_numbers = #tpu.dot_dimension_numbers<[1], [0], [0], [1], [0, 0, 1, 1], [], []>} : vector<8x8xbf16>, vector<8x16xbf16>, vector<8x16xf32> -> vector<8x16xf32>
    %29 = arith.addf %26, %28 : vector<8x16xf32>
    %c0_19 = arith.constant 0 : index
    %c0_20 = arith.constant 0 : index
    %30 = vector.load %arg9[%c0_19, %c0_20] : memref<8x16xf32, #tpu.memory_space<vmem>>, vector<8x16xf32>
    tpu.vector_store %arg9[%c0_19, %c0_20], %29 {strides = array<i32>} : memref<8x16xf32, #tpu.memory_space<vmem>>, vector<8x16xf32>,
    %c0_21 = arith.constant 0 : index
    %c0_22 = arith.constant 0 : index
    %31 = vector.load %arg7[%c0_21, %c0_22] : memref<8x1xf32, #tpu.memory_space<vmem>>, vector<8x1xf32>
    tpu.vector_store %arg7[%c0_21, %c0_22], %12 {strides = array<i32>} : memref<8x1xf32, #tpu.memory_space<vmem>>, vector<8x1xf32>,
    %c0_i32_23 = arith.constant 0 : i32
    %32 = arith.cmpi eq, %arg2, %c0_i32_23 : i32
    %33 = arith.extui %32 : i1 to i32
    %c0_i32_24 = arith.constant 0 : i32
    %34 = arith.cmpi ne, %33, %c0_i32_24 : i32
    scf.if %34 {
      %c0_25 = arith.constant 0 : index
      %c0_26 = arith.constant 0 : index
      %35 = vector.load %arg8[%c0_25, %c0_26] : memref<8x1xf32, #tpu.memory_space<vmem>>, vector<8x1xf32>
      %36 = tpu.reciprocal %35 {approx = true} : vector<8x1xf32> -> vector<8x1xf32>
      %c0_27 = arith.constant 0 : index
      %c0_28 = arith.constant 0 : index
      %37 = vector.load %arg9[%c0_27, %c0_28] : memref<8x16xf32, #tpu.memory_space<vmem>>, vector<8x16xf32>
      %38 = vector.broadcast %36 : vector<8x1xf32> to vector<8x16xf32>
      %39 = arith.mulf %37, %38 : vector<8x16xf32>
      %c0_29 = arith.constant 0 : index
      %c0_30 = arith.constant 0 : index
      %c0_31 = arith.constant 0 : index
      %40 = vector.load %arg6[%c0_29, %c0_30, %c0_31] : memref<1x8x16xf32, #tpu.memory_space<vmem>>, vector<1x8x16xf32>
      %41 = vector.shape_cast %40 : vector<1x8x16xf32> to vector<8x16xf32>
      %42 = vector.shape_cast %39 : vector<8x16xf32> to vector<1x8x16xf32>
      tpu.vector_store %arg6[%c0_29, %c0_30, %c0_31], %42 {strides = array<i32>} : memref<1x8x16xf32, #tpu.memory_space<vmem>>, vector<1x8x16xf32>,
    } else {
    }
    return
  }
  func.func @transform_0(%arg0: i32, %arg1: i32, %arg2: i32) -> (i32, i32, i32) {
    %c0_i32 = arith.constant 0 : i32
    %c0_i32_0 = arith.constant 0 : i32
    return %arg0, %arg1, %c0_i32 : i32, i32, i32
  }
  func.func @transform_1(%arg0: i32, %arg1: i32, %arg2: i32) -> (i32, i32, i32) {
    %c0_i32 = arith.constant 0 : i32
    %c0_i32_0 = arith.constant 0 : i32
    return %arg0, %arg2, %c0_i32 : i32, i32, i32
  }
  func.func @transform_2(%arg0: i32, %arg1: i32, %arg2: i32) -> (i32, i32, i32) {
    %c0_i32 = arith.constant 0 : i32
    %c0_i32_0 = arith.constant 0 : i32
    return %arg0, %arg2, %c0_i32 : i32, i32, i32
  }
  func.func @transform_3(%arg0: i32, %arg1: i32, %arg2: i32) -> (i32, i32, i32) {
    %c0_i32 = arith.constant 0 : i32
    %c0_i32_0 = arith.constant 0 : i32
    return %arg0, %arg1, %c0_i32 : i32, i32, i32
  }
}

</mosaic_0001>

<bundles_post_ra>
// kernel: tpu_custom_call.1
= control target key start
LH: loop header
LB: loop body
LE: loop exit
PB: predicated region body
PF: predicated region fallthrough
CT: control target
= control target key end

     0   :  { %s1192_s0 = inlined_call_operand.hbm [shape: bf16[8,8,16], index: 0, kind: input, shape index: {}]   ;;  %s1193_s1 = inlined_call_operand.hbm [shape: bf16[8,8,16], index: 1, kind: input, shape index: {}]   ;;  %s1194_s2 = inlined_call_operand.hbm [shape: bf16[8,8,16], index: 2, kind: input, shape index: {}]   ;;  %s1195_s3 = inlined_call_operand.hbm [shape: f32[8,8,16], index: 3, kind: output, shape index: {}]  }
   0x1   :  { %1201 = sst [smem:[#allocation19_spill]] %s1193_s1 }
   0x2   :  { %8 = vsyncpa [#allocation7], 0 }
   0x3   :  { %10 = vsyncpa [#allocation7 + $0x1], 0 }
   0x4   :  { %11 = vsyncpa [#allocation10], 0 }
   0x5   :  { %13 = vsyncpa [#allocation10 + $0x1], 0 }
   0x6   :  { %14 = vsyncpa [#allocation8], 0 }
   0x7   :  { %16 = vsyncpa [#allocation8 + $0x1], 0  ;;  %s918_s12 = smov 0   ;;  %s920_s13 = smov 0  }
   0x8   :  { %s922_s14 = smov 0   ;;  %s924_s15 = smov 0  }
   0x9   :  { %s926_s16 = smov 0   ;;  %s928_s17 = smov 0  }
   0xa LB: > { %1202 = sst [smem:[#allocation16_spill]] %s884_s16  ;;  %s949_s18 = sadd.s32 4294967295, %s888_s17   ;;  %s888_s17 = sphi %s928_s17, %s22_s17   ;;  %s884_s16 = sphi %s926_s16, %s1222_s16   ;;  %s880_s15 = sphi %s924_s15, %s1221_s15   ;;  %s876_s14 = sphi %s922_s14, %s1225_s14   ;;  %s872_s13 = sphi %s920_s13, %s1224_s13   ;;  %s868_s12 = sphi %s918_s12, %s1223_s12  }
   0xb   : > { %s592_s19 = sadd.s32 4294967294, %s888_s17   ;;  %s41_s20 = sadd.s32 1, %s884_s16 }
   0xc   : > { %s50_s21 = sadd.s32 1, %s876_s14  ;;  %p43_p0 = scmp.ge.s32.totalorder %s41_s20, 8 }
   0xd   : > { %p57_p1 = scmp.ne.s32.totalorder %s876_s14, %s872_s13  ;;  %p58_p2 = scmp.eq.s32.totalorder %s888_s17, 0 }
   0xe   : > { %p63_p3 = scmp.ne.s32.totalorder %s872_s13, %s868_s12  ;;  %s1227_s20 = smov (%p43_p0, %s41_s20), 0 }
   0xf   : > { %1203 = sst [smem:[#allocation17_spill]] %s1227_s20  ;;  %p961_p4 = por %p58_p2, %p57_p1 }
  0x10   : > { %p64_p5 = scmp.eq.s32.totalorder %s949_s18, 0  ;;  %s45_s23 = ssub.s32 %s884_s16, %s1227_s20 }
  0x11   : > { %p145_p6 = scmp.eq.s32.totalorder %s949_s18, 7  ;;  %p48_p7 = scmp.eq.s32.totalorder %s45_s23, 0 }
  0x12   : > { %p969_p8 = por %p64_p5, %p63_p3  ;;  %p151_p10 = scmp.eq.s32.totalorder %s592_s19, 7 }
  0x13   : > { %p973_p9 = por %p145_p6, %p57_p1  ;;  %p650_p12 = scmp.lt.s32.totalorder %s888_s17, 8 }
  0x14   : > { %s1205_s24 = scalar_select %p969_p8, 1, 0 }
  0x15   : > { %s1206_s25 = scalar_select %p973_p9, 1, 0 }
  0x16   : > { %s978_s26 = scalar_select %p48_p7, %s876_s14, %s50_s21  }
  0x17   : > { %p980_p11 = por %p151_p10, %p63_p3  ;;  %s171_s28 = sand.u32 1, %s876_s14  }
  0x18   : > { %1207 = sst [smem:[#allocation18_spill]] %s978_s26  ;;  %s988_s29 = sshll.u32 %s171_s28, 2 }
  0x19   : > { %s1208_s27 = scalar_select %p980_p11, 1, 0 }
  0x1a   : > { %s991_s30 = sshll.u32 %s884_s16, 6  ;;  %p995_p13 = pnand %p650_p12, %p961_p4 }
  0x1b   : > { %s190_s5 = sand.u32 1, %s888_s17   ;;  %s1210_s1 = sld [smem:[#allocation19_spill]] }
  0x1c   : > { %s1209_s4 = scalar_select %p995_p13, 1, 0 }
  0x1d   : > { %s194_s9 = scalar_lea.vmem [#allocation9], %s988_s29  ;;  %s1011_s11 = scalar_lea.sflag [#allocation10], %s190_s5 }
  0x1e   : > { %s202_s10 = sshll.u32 %s194_s9, 4  ;;  %p1017_p3 = pneg %p995_p13  ;;  %s1008_s10 = int_to_ptr.vmem [resolvable:$true] %s202_s10 }
  0x21   : > { %s1004_s8 = scalar_lea.hbm %s1210_s1, %s991_s30  ;;  %s717_s6 = scalar_lea.hbm %s1210_s1, 512 }
  0x22   : > { %s712_s19 = scalar_lea.hbm %s1004_s8, 64  ;;  %p718_p6 = scmp.lt.u32.totalorder %s1004_s8, %s1210_s1 }
  0x23   : > { %p713_p2 = scmp.ne.s32.totalorder %s1004_s8, %s712_s19  ;;  %p719_p7 = scmp.lt.u32.totalorder %s717_s6, %s712_s19 }
  0x24   : > { %p721_p12 = scmp.lt.u32.totalorder %s712_s19, %s1004_s8 }
  0x25   : > { %p715_p4 = pnand %p1017_p3, %p713_p2  ;;  %p720_p10 = por %p719_p7, %p718_p6 }
  0x27   : > { %p716_p5 = pneg %p715_p4  ;;  %p722_p0 = por %p721_p12, %p720_p10 }
  0x29   : > { %p723_p1 = pnand %p722_p0, %p716_p5 }
  0x2b   : > { %726 = shalt.err (!%p723_p1)
}
  0x2c   : > { %s727_s5 = scalar_lea.vmem %s1008_s10, 64  ;;  %s890_s22 = smov [#allocation9]  }
  0x2d   : > { %p728_p2 = scmp.ne.s32.totalorder %s1008_s10, %s727_s5  ;;  %s732_s23 = sshll.u32 %s890_s22, 4  ;;  %s733_s23 = int_to_ptr.vmem [resolvable:$false] %s732_s23 }
  0x2e   : > { %s734_s7 = scalar_lea.vmem %s733_s23, 128  ;;  %p735_p9 = scmp.lt.s32.totalorder %s1008_s10, %s733_s23 }
  0x2f   : > { %p730_p4 = pnand %p728_p2, %p1017_p3  ;;  %p736_p8 = scmp.lt.s32.totalorder %s734_s7, %s727_s5 }
  0x31   : > { %p731_p11 = pneg %p730_p4  ;;  %p737_p6 = por %p736_p8, %p735_p9 }
  0x33   : > { %p738_p7 = pnand %p737_p6, %p731_p11 }
  0x35   : > { %741 = shalt.err (!%p738_p7)
}
  0x36   : > { %642 = dma.hbm_to_vmem [thread:$0]  (!%p995_p13), %s1004_s8, 64, %s1008_s10, %s1011_s11  }
  0x37   : > { %p1212_p0 = scmp.lt.s32.totalorder %s888_s17, 9  ;;  %p1213_p1 = scmp.ge.s32.totalorder %s888_s17, 1 }
  0x38   : > { %s1053_s5 = scalar_lea.hbm %s1192_s0, %s991_s30  ;;  %s175_s22 = scalar_lea.vmem [#allocation6], %s988_s29 }
  0x39   : > { %p1045_p5 = pnand %p1213_p1, %p1212_p0  ;;  %s183_s23 = sshll.u32 %s175_s22, 4  ;;  %s1056_s23 = int_to_ptr.vmem [resolvable:$true] %s183_s23 }
  0x3a   : > { %s1062_s7 = scalar_lea.hbm %s1194_s2, %s991_s30  ;;  %s172_s1 = scalar_lea.sflag [#allocation7], %s171_s28 }
  0x3b   : > { %s1214_s19 = scalar_select %p1045_p5, 1, 0 }
  0x3c   : > { %s742_s20 = scalar_lea.hbm %s1053_s5, 64  ;;  %s747_s16 = scalar_lea.hbm %s1192_s0, 512 }
  0x3d   : > { %p743_p8 = scmp.ne.s32.totalorder %s1053_s5, %s742_s20  ;;  %p748_p10 = scmp.lt.u32.totalorder %s1053_s5, %s1192_s0 }
  0x3e   : > { %p749_p12 = scmp.lt.u32.totalorder %s747_s16, %s742_s20  ;;  %p751_p4 = scmp.lt.u32.totalorder %s742_s20, %s1053_s5 }
  0x3f   : > { %p745_p9 = pnand %p743_p8, %p1017_p3 }
  0x40   : > { %p750_p2 = por %p749_p12, %p748_p10 }
  0x41   : > { %p746_p11 = pneg %p745_p9 }
  0x42   : > { %p752_p6 = por %p751_p4, %p750_p2 }
  0x44   : > { %p753_p7 = pnand %p752_p6, %p746_p11 }
  0x46   : > { %756 = shalt.err (!%p753_p7)
}
  0x47   : > { %s757_s28 = scalar_lea.vmem %s1056_s23, 64  ;;  %s891_s30 = smov [#allocation6]  }
  0x48   : > { %p758_p0 = scmp.ne.s32.totalorder %s1056_s23, %s757_s28  ;;  %s762_s8 = sshll.u32 %s891_s30, 4  ;;  %s763_s8 = int_to_ptr.vmem [resolvable:$false] %s762_s8 }
  0x49   : > { %s764_s26 = scalar_lea.vmem %s763_s8, 128  ;;  %p765_p9 = scmp.lt.s32.totalorder %s1056_s23, %s763_s8 }
  0x4a   : > { %p760_p1 = pnand %p758_p0, %p1017_p3  ;;  %p766_p5 = scmp.lt.s32.totalorder %s764_s26, %s757_s28 }
  0x4c   : > { %p761_p8 = pneg %p760_p1  ;;  %p767_p10 = por %p766_p5, %p765_p9 }
  0x4e   : > { %p768_p12 = pnand %p767_p10, %p761_p8 }
  0x50   : > { %771 = shalt.err (!%p768_p12)
}
  0x51   : > { %639 = dma.hbm_to_vmem [thread:$0]  (!%p995_p13), %s1053_s5, 64, %s1056_s23, %s172_s1  }
  0x52   : > { %s213_s16 = scalar_lea.vmem [#allocation11], %s988_s29  ;;  %s772_s10 = scalar_lea.hbm %s1062_s7, 64 }
  0x53   : > { %s221_s20 = sshll.u32 %s213_s16, 4  ;;  %p773_p11 = scmp.ne.s32.totalorder %s1062_s7, %s772_s10  ;;  %s222_s20 = int_to_ptr.vmem [resolvable:$true] %s221_s20 }
  0x54   : > { %s777_s22 = scalar_lea.hbm %s1194_s2, 512  ;;  %p778_p4 = scmp.lt.u32.totalorder %s1062_s7, %s1194_s2 }
  0x55   : > { %p775_p5 = pnand %p773_p11, %p1017_p3  ;;  %p779_p6 = scmp.lt.u32.totalorder %s777_s22, %s772_s10 }
  0x56   : > { %p781_p0 = scmp.lt.u32.totalorder %s772_s10, %s1062_s7 }
  0x57   : > { %p776_p2 = pneg %p775_p5  ;;  %p780_p7 = por %p779_p6, %p778_p4 }
  0x59   : > { %p782_p1 = por %p781_p0, %p780_p7 }
  0x5b   : > { %p783_p8 = pnand %p782_p1, %p776_p2 }
  0x5d   : > { %786 = shalt.err (!%p783_p8)
}
  0x5e   : > { %s787_s1 = scalar_lea.vmem %s222_s20, 64  ;;  %s892_s29 = smov [#allocation11]  }
  0x5f   : > { %p788_p9 = scmp.ne.s32.totalorder %s222_s20, %s787_s1  ;;  %s792_s5 = sshll.u32 %s892_s29, 4  ;;  %s793_s5 = int_to_ptr.vmem [resolvable:$false] %s792_s5 }
  0x60   : > { %s794_s23 = scalar_lea.vmem %s793_s5, 128  ;;  %p795_p11 = scmp.lt.s32.totalorder %s222_s20, %s793_s5 }
  0x61   : > { %p790_p10 = pnand %p788_p9, %p1017_p3  ;;  %p796_p5 = scmp.lt.s32.totalorder %s794_s23, %s787_s1 }
  0x63   : > { %p791_p12 = pneg %p790_p10  ;;  %p797_p13 = por %p796_p5, %p795_p11 }
  0x65   : > { %p798_p4 = pnand %p797_p13, %p791_p12 }
  0x67   : > { %801 = shalt.err (!%p798_p4)
}
  0x68   : > { %p1215_p6 = scmp.ne.s32.totalorder %s1209_s4, 0  ;;  %p1216_p2 = scmp.ne.s32.totalorder %s1214_s19, 0 }
  0x69   : > { %s1109_s21 = sand.u32 (!%p1216_p2), 1, %s872_s13   ;;  %p1217_p13 = scmp.ne.s32.totalorder (!%p1216_p2), %s1205_s24, 0 }
  0x6a   : > { %645 = dma.hbm_to_vmem [thread:$0]  (!%p1215_p6), %s1062_s7, 64, %s222_s20, %s1011_s11  }
  0x6b   : > { %230 = sbr.rel (%p1216_p2) target bundleno = 938 (0x3aa), region = 32  ;;  %s1112_s8 = sshll.u32 (!%p1216_p2), %s1109_s21, 2 }
  0x6c   : > { %s233_s26 = scalar_lea.sflag (!%p1216_p2), [#allocation7], %s1109_s21  ;;  %s236_s16 = scalar_lea.vmem (!%p1216_p2), [#allocation6], %s1112_s8 }
  0x72   : > { %855 = dma.done.wait (%p1217_p13), %s233_s26, 64  }
  0x73   : > { %857 = vsyncadd (%p1217_p13), %s233_s26, 4294967232  ;;  %s241_s4 = sand.u32 1, %s949_s18   ;;  %s245_s19 = scalar_lea.vmem [#allocation9], %s1112_s8 }
  0x74   : > { %s242_s11 = scalar_lea.sflag [#allocation10], %s241_s4 }
  0x75   : > { %859 = dma.done.wait (%p1217_p13), %s242_s11, 128  }
  0x76   : > { %861 = vsyncadd (%p1217_p13), %s242_s11, 4294967168  ;;  %vm296_vm0 = vcmask 130048   ;;  %v893_v0 = vmov 0.0   ;;  %vm894_vm1 = vmmov 0   ;;  %v303_v1 = vld [vmem:[%s245_s19] sm:$0xf] }
  0x77   : > { %616 = vmatprep.subr.bf16.mxu0 %v893_v0  ;;  %297 = vst.msk [vmem:[#allocation4] sm:$0xff] %vm296_vm0, %v893_v0  ;;  %618 = vmatprep.mubr.msk.bf16.mxu0 %vm894_vm1, %v893_v0  ;;  %v298_v2 = vld [vmem:[%s236_s16] sm:$0xf]  ;;  %vm300_vm2 = vcmask 125952   ;;  %v310_v3 = vsel %vm296_vm0, %v303_v1, 0  ;;  %vm293_vm3 = vcmask 7168  }
  0x78   : > { %622 = vmatprep.subr.bf16.mxu1 %v893_v0  ;;  %624 = vmatprep.mubr.msk.bf16.mxu1 %vm894_vm1, %v893_v0  ;;  %v299_v4 = vmul.bf16 1048592000, %v298_v2  ;;  %v895_v6 = vmov -inf   ;;  %295 = vst.msk [vmem:[#allocation3] sm:$0xff] %vm293_vm3, %v893_v0  ;;  %vm353_vm4 = vcmask 64512   ;;  %v896_v12 = vmov 0  }
  0x79   : > { %617 = vmatpush3.bf16.xpose.msra.mxu0 %v310_v3  ;;  %294 = vst.msk [vmem:[#allocation2] sm:$0xff] %vm293_vm3, %v895_v6  ;;  %704 = vset.pattern.permute.xlu0 %v896_v12  ;;  %vm388_vm5 = vcmask 1043456   ;;  %s254_s18 = scalar_lea.vmem [#allocation11], %s1112_s8  ;;  %s605_s24 = sshll.u32 %s1109_s21, 3 }
  0x7a   : > { %301 = vst.msk [vmem:[#allocation5] sm:$0xf] %vm300_vm2, %v299_v4  ;;  %705 = vset.pattern.permute.xlu1 %v896_v12  ;;  %v304_v17 = vld [vmem:[%s254_s18] sm:$0xf]  ;;  %s609_s7 = sshll.u32 %s880_s15, 7  ;;  %s286_s20 = scalar_lea.vmem [#allocation12], %s605_s24 }
  0x7b   : > { %v390_v18 = vsel %vm388_vm5, %v304_v17, 0  ;;  %s463_s10 = sshll.u32 %s286_s20, 4  ;;  %s1143_s22 = scalar_lea.hbm %s1195_s3, %s609_s7  ;;  %s1145_s10 = int_to_ptr.vmem [resolvable:$true] %s463_s10 }
  0x7c   : > { %623 = vmatpush3.bf16.msra.mxu1 %v390_v18  ;;  %s449_s28 = scalar_lea.sflag [#allocation8], %s1109_s21  ;;  %s802_s30 = scalar_lea.vmem %s1145_s10, 128 }
  0x7d   : > { %p803_p3 = scmp.ne.s32.totalorder %s1145_s10, %s802_s30  ;;  %p1218_p7 = scmp.ne.s32.totalorder %s1206_s25, 0 }
  0x7e   : > { %v377_v33 = vld [vmem:[#allocation4] sm:$0xff]  ;;  %s897_s15 = smov [#allocation12]  }
  0x7f   : > { %v369_v27 = vld [vmem:[#allocation3] sm:$0xff]  ;;  %p804_p0 = pnand %p803_p3, %p1218_p7  ;;  %s806_s1 = sshll.u32 %s897_s15, 4  ;;  %s807_s1 = int_to_ptr.vmem [resolvable:$false] %s806_s1 }
  0x80   : > { %v352_v13 = vld [vmem:[#allocation2] sm:$0xff]  ;;  %s808_s29 = scalar_lea.vmem %s807_s1, 256  ;;  %p809_p8 = scmp.lt.s32.totalorder %s1145_s10, %s807_s1 }
  0x81   : > { %v302_v5 = vld [vmem:[#allocation5] sm:$0xf]  ;;  %p805_p1 = pneg %p804_p0  ;;  %p810_p9 = scmp.lt.s32.totalorder %s808_s29, %s802_s30 }
  0x82   : > { %619 = vmatmul.mubr.msk.bf16.vlgmr.msra.gmra.mrb[0].mxu0 %vm296_vm0, %v302_v5 }
  0x83   : > { %p811_p10 = por %p810_p9, %p809_p8 }
  0x85   : > { %p812_p12 = pnand %p811_p10, %p805_p1 }
 0x155   : > { %v346_v7 = vpop.f32.mrb[0].mxu0 }
 0x156   : > { %v620_v8 = vpop.f32.mrb[1].mxu0  ;;  %v354_v9 = vsel %vm353_vm4, %v346_v7, -inf }
 0x157   : > { %355 = vmax.xlane.f32.xlu0 %v354_v9  ;;  %v349_v10 = vpop.f32.mrb[2].mxu0 }
 0x158   : > { %v621_v11 = vpop.f32.mrb[3].mxu0 }
 0x1e4   : > { %v356_v14 = vpop.xlane.xlu0 %355 }
 0x1e5   : > { %v357_v15 = vmax.f32 %v352_v13, %v356_v14 }
 0x1e7   : > { %v358_v16 = vsub.f32 %v352_v13, %v357_v15  ;;  %434 = vst.msk [vmem:[#allocation2] sm:$0xff] %vm293_vm3, %v357_v15  ;;  %363 = vperm.xlu0 %704, %v357_v15  }
 0x1e9   : > { %v359_v25 = vmul.f32 1.442695, %v358_v16 }
 0x266   : > { %v364_v19 = vpop.permute.xlu0 %363 }
 0x267   : > { %v366_v20 = vsub.f32 %v346_v7, %v364_v19 }
 0x269   : > { %v367_v21 = vmul.f32 1.442695, %v366_v20 }
 0x26b   : > { %706 = vpow2.f32 %v367_v21 }
 0x26c   : > { %708 = vpow2.f32 %v359_v25 }
 0x275   : > { %v707_v22 = vpop.eup %706 }
 0x276   : > { %v371_v23 = vsel %vm353_vm4, %v707_v22, 0.0  ;;  %v384_v24 = vpack.c.bf16 %v707_v22, %v707_v22  ;;  %v709_v26 = vpop.eup %708 }
 0x277   : > { %372 = vadd.xlane.f32.xlu1 %v371_v23  ;;  %v370_v28 = vmul.f32 %v709_v26, %v369_v27 }
 0x278   : > { %625 = vmatmul.mubr.msk.bf16.vlgmr.msra.gmra.mrb[0].mxu1 %vm353_vm4, %v384_v24 }
 0x288   : > { %380 = vperm.xlu1 %705, %v709_v26  }
 0x304   : > { %v373_v29 = vpop.xlane.xlu1 %372 }
 0x305   : > { %v374_v30 = vadd.f32 %v373_v29, %v370_v28 }
 0x307   : > { %376 = vst.msk [vmem:[#allocation3] sm:$0xff] %vm293_vm3, %v374_v30 }
 0x308   : > { %v381_v34 = vpop.permute.xlu1 %380 }
 0x309   : > { %v383_v35 = vmul.f32 %v381_v34, %v377_v33 }
 0x30e   : > { %v438_v31 = vld [vmem:[#allocation3] sm:$0xff] }
 0x30f   : > { %710 = vrcp.f32 %v438_v31 }
 0x319   : > { %v711_v32 = vpop.eup %710 }
 0x31a   : > { %443 = vperm.xlu1 %705, %v711_v32  }
 0x34b   : > { %v426_v36 = vpop.f32.mrb[0].mxu1 }
 0x34c   : > { %v432_v37 = vadd.f32 %v426_v36, %v383_v35  ;;  %v626_v38 = vpop.f32.mrb[1].mxu1 }
 0x34d   : > { %v429_v39 = vpop.f32.mrb[2].mxu1 }
 0x34e   : > { %433 = vst.msk [vmem:[#allocation4] sm:$0xff] %vm296_vm0, %v432_v37  ;;  %v627_v40 = vpop.f32.mrb[3].mxu1 }
 0x355   : > { %v440_v41 = vld [vmem:[#allocation4] sm:$0xff] }
 0x399   : > { %v444_v42 = vpop.permute.xlu1 %443 }
 0x39a   : > { %v446_v43 = vmul.f32 %v444_v42, %v440_v41 }
 0x39c   : > { %447 = vst.msk [vmem:[%s286_s20] sm:$0xff] %vm296_vm0, %v446_v43 }
 0x39d   : > { %815 = shalt.err (!%p812_p12)
}
 0x39e   : > { %s816_s5 = scalar_lea.hbm %s1143_s22, 128  ;;  %s820_s8 = scalar_lea.hbm %s1195_s3, 1024 }
 0x39f   : > { %p817_p11 = scmp.ne.s32.totalorder %s1143_s22, %s816_s5  ;;  %p821_p6 = scmp.lt.u32.totalorder %s1143_s22, %s1195_s3 }
 0x3a0   : > { %p822_p2 = scmp.lt.u32.totalorder %s820_s8, %s816_s5  ;;  %p824_p3 = scmp.lt.u32.totalorder %s816_s5, %s1143_s22 }
 0x3a1   : > { %p818_p5 = pnand %p817_p11, %p1218_p7 }
 0x3a2   : > { %p823_p13 = por %p822_p2, %p821_p6 }
 0x3a3   : > { %p819_p4 = pneg %p818_p5 }
 0x3a4   : > { %p825_p0 = por %p824_p3, %p823_p13 }
 0x3a6   : > { %p826_p1 = pnand %p825_p0, %p819_p4 }
 0x3a8   : > { %829 = shalt.err (!%p826_p1)
}
 0x3a9   : > { %634 = dma.vmem_to_hbm [thread:$0]  (%p1218_p7), %s1145_s10, 128, %s1143_s22, %s449_s28  }
 0x3aa PF: > { %p651_p8 = scmp.ge.s32.totalorder %s888_s17, 2  ;;  %s475_s4 = sand.u32 1, %s868_s12  }
 0x3ab   : > { %p1219_p9 = scmp.ne.s32.totalorder %s1208_s27, 0  ;;  %s476_s11 = scalar_lea.sflag [#allocation8], %s475_s4 }
 0x3ad   : > { %p647_p10 = pnand %p651_p8, %p1219_p9 }
 0x3af   : > { %863 = dma.done.wait (!%p647_p10), %s476_s11, 128  }
 0x3b0   : > { %865 = vsyncadd (!%p647_p10), %s476_s11, 4294967168  ;;  %s22_s17 = sadd.s32 1, %s888_s17   ;;  %s1220_s25 = sld [smem:[#allocation18_spill]] }
 0x3b1   : > { %p19_p12 = scmp.ge.s32.totalorder %s22_s17, 10   ;;  %s1221_s15 = sld [smem:[#allocation16_spill]] }
 0x3b2   : > { %s1222_s16 = sld [smem:[#allocation17_spill]]  ;;  %s1223_s12 = smov %s872_s13 }
 0x3b3   : > { %s1224_s13 = smov %s876_s14  ;;  %21 = sbr.rel (!%p19_p12) target bundleno = 10 (0xa), region = 109 }
 0x3b6   : > { %s1225_s14 = smov %s1220_s25 }
 0x3ba   :  { %481 = vsyncpa [#allocation7], 1 }
 0x3bb   :  { %483 = vsyncpa [#allocation7 + $0x1], 1 }
 0x3bc   :  { %484 = vsyncpa [#allocation10], 1 }
 0x3bd   :  { %486 = vsyncpa [#allocation10 + $0x1], 1 }
 0x3be   :  { %487 = vsyncpa [#allocation8], 1 }
 0x3bf   :  { %489 = vsyncpa [#allocation8 + $0x1], 1 }

</bundles_post_ra>
